<compile_context>
chip_gen: v5e
topology: v5e:2x2
jax: 0.10.0
libtpu: 0.0.40
codegen_flags: <defaults>
</compile_context>

<pallas_src>
import functools

import jax
import jax.numpy as jnp
from jax import lax
from jax.experimental import pallas as pl
from jax.experimental.pallas import tpu as pltpu


_STATIC_UNROLL_MAX = 32                 # fully unroll layer loop up to this depth
_VMEM_TILE_BUDGET = 8 * 1024 * 1024     # double-buffered tile budget (bytes)
_TB_MAX = 32 * 1024                     # lane-tile cap


def _normalizing_flow_kernel(b_ref, ws_ref, z_ref, w_ref, s_ref,
                             zk_ref, lj_ref, *, flow_length, unrolled):
    """All flow layers for one batch tile, batch-on-lanes layout.

    b_ref : (L,)        SMEM  per-layer biases
    ws_ref: (L,)        SMEM  precomputed <w_l, s_l>
    z_ref : (dim, TB)   VMEM  z tile (features on sublanes, batch on lanes)
    w_ref : (L, dim, 1) VMEM  per-layer weights (leading-axis indexable)
    s_ref : (L, dim, 1) VMEM  per-layer scales
    zk_ref: (dim, TB)   VMEM  output z_K tile
    lj_ref: (L, TB)     VMEM  stacked log-Jacobians (lane-dense)
    """
    z = z_ref[...].astype(jnp.float32)

    def layer(l, z):
        w_col = w_ref[l]            # (dim, 1): leading-axis index, no lane slice
        s_col = s_ref[l]            # (dim, 1)
        b = b_ref[l]                # scalar (SMEM)
        ws = ws_ref[l]              # scalar (SMEM)

        # activation = F.linear(z, w_l, b_l) -> lane-dense (1, TB)
        act = jnp.sum(z * w_col, axis=0, keepdims=True) + b
        t = jnp.tanh(act)

        # log|det| uses z BEFORE the transform (encoded via `act`):
        #   psi @ s_l.T = (1 - tanh(act)^2) * <w_l, s_l>
        det_grad = 1.0 + (1.0 - t * t) * ws
        lj_row = jnp.log(jnp.abs(det_grad) + 1e-7)        # (1, TB)

        # planar-flow update
        return z + s_col * t, lj_row

    if unrolled:
        rows = []
        for l in range(flow_length):     # static unroll: LLO sees the whole body
            z, lj_row = layer(l, z)
            rows.append(lj_row)
        lj_ref[...] = jnp.concatenate(rows, axis=0)        # single block store
    else:
        def body(l, z):
            z, lj_row = layer(l, z)
            lj_ref[pl.ds(l, 1), :] = lj_row
            return z
        z = lax.fori_loop(0, flow_length, body, z, unroll=4)

    zk_ref[...] = z.astype(zk_ref.dtype)


def _choose_tile(B, dim, L):
    """Pick (TB, grid) for the 1-D batch grid from a VMEM budget."""
    # Double-buffered f32 bytes per batch column: z-in + zk-out + lj-out.
    per_col = 2 * (2 * dim + L) * 4
    tb_cap = (_VMEM_TILE_BUDGET // per_col) // 128 * 128
    tb_cap = max(128, min(_TB_MAX, tb_cap))

    if B < 256:
        # Tiny batch: one full-array tile (nothing worth splitting / padding).
        return B, 1

    # At least 2 tiles so the "parallel" axis can shard across v7x's 2 TCs.
    TB = min(tb_cap, pl.cdiv(pl.cdiv(B, 2), 128) * 128)
    grid = pl.cdiv(B, TB)
    if grid % 2 == 1:
        # Nudge toward an even grid for a balanced megacore split, but only if
        # the resulting grid really has grid+1 tiles (never a fully-OOB block).
        TB2 = pl.cdiv(pl.cdiv(B, grid + 1), 128) * 128
        if pl.cdiv(B, TB2) == grid + 1:
            TB, grid = TB2, grid + 1
    return TB, grid


def normalizing_flow_dim_major(zT, weights, scales, biases):
    """Core entry point, feature-major layout (no transposes anywhere).

    zT: (dim, B); weights/scales: (L, dim); biases: (L,).
    Returns (zkT (dim, B), log_jacobians (L, B)).
    """
    dim, B = zT.shape
    L = weights.shape[0]

    w32 = weights.astype(jnp.float32)
    s32 = scales.astype(jnp.float32)
    ws = jnp.sum(w32 * s32, axis=-1)              # (L,)  <w_l, s_l>
    w3 = w32.reshape(L, dim, 1)                   # leading-axis indexable
    s3 = s32.reshape(L, dim, 1)

    TB, grid = _choose_tile(B, dim, L)
    unrolled = L <= _STATIC_UNROLL_MAX

    kernel = functools.partial(_normalizing_flow_kernel,
                               flow_length=L, unrolled=unrolled)

    zkT, lj = pl.pallas_call(
        kernel,
        grid=(grid,),
        out_shape=(
            jax.ShapeDtypeStruct((dim, B), zT.dtype),
            jax.ShapeDtypeStruct((L, B), jnp.float32),
        ),
        in_specs=[
            pl.BlockSpec(memory_space=pltpu.MemorySpace.SMEM),   # biases (L,)
            pl.BlockSpec(memory_space=pltpu.MemorySpace.SMEM),   # ws     (L,)
            pl.BlockSpec((dim, TB), lambda i: (0, i)),           # zT tile
            pl.BlockSpec((L, dim, 1), lambda i: (0, 0, 0)),      # w
            pl.BlockSpec((L, dim, 1), lambda i: (0, 0, 0)),      # s
        ],
        out_specs=(
            pl.BlockSpec((dim, TB), lambda i: (0, i)),           # zkT tile
            pl.BlockSpec((L, TB), lambda i: (0, i)),             # lj (lane-dense)
        ),
        compiler_params=pltpu.CompilerParams(
            dimension_semantics=("parallel",),
            vmem_limit_bytes=32 * 1024 * 1024),
    )(biases.astype(jnp.float32), ws, zT, w3, s3)

    return zkT, lj


@jax.jit
def normalizing_flow(z, weights, scales, biases):
    """(B, dim) adapter matching the PyTorch module's data layout.

    Returns (zk (B, dim), log_jacobians (L, B) stacked).
    Per-layer (B, 1) views can be taken lazily via `log_jacobians_as_list`.
    """
    zkT, lj = normalizing_flow_dim_major(z.T, weights, scales, biases)
    return zkT.T, lj


def log_jacobians_as_list(lj):
    """(L, B) stacked log-Jacobians -> list of (B, 1) arrays (module's view).

    Apply lazily / inside jit if needed on a hot path; the kernel wrapper
    deliberately does not materialise this list.
    """
    return [lj[l][:, None] for l in range(lj.shape[0])]


def _reference(z, weights, scales, biases):
    """Pure-JAX reference mirroring the PyTorch forward."""
    log_jacs = []
    for l in range(weights.shape[0]):
        w = weights[l:l + 1]       # (1, dim)
        s = scales[l:l + 1]        # (1, dim)
        b = biases[l]
        act = z @ w.T + b          # (B, 1)
        t = jnp.tanh(act)
        psi = (1.0 - t ** 2) * w
        det_grad = 1.0 + psi @ s.T
        log_jacs.append(jnp.log(jnp.abs(det_grad) + 1e-7))
        z = z + s * t
    return z, log_jacs


if __name__ == "__main__":
    B, DIM, FLOW_LENGTH = 8, 4, 3

    key = jax.random.PRNGKey(0)
    kz, kw, ks, kb, kz2 = jax.random.split(key, 5)

    # deterministic stand-in for nn.Parameter.uniform_(-0.1, 0.1)
    weights = jax.random.uniform(kw, (FLOW_LENGTH, DIM), jnp.float32, -0.1, 0.1)
    scales = jax.random.uniform(ks, (FLOW_LENGTH, DIM), jnp.float32, -0.1, 0.1)
    biases = jax.random.uniform(kb, (FLOW_LENGTH,), jnp.float32, -0.1, 0.1)

    z = jax.random.normal(kz, (B, DIM), jnp.float32)

    zk, lj = normalizing_flow(z, weights, scales, biases)
    zk = jax.block_until_ready(zk)
    lj = jax.block_until_ready(lj)

    zk_ref, lj_list_ref = _reference(z, weights, scales, biases)
    assert zk.shape == (B, DIM)
    assert lj.shape == (FLOW_LENGTH, B)
    assert jnp.allclose(zk, zk_ref, atol=1e-5, rtol=1e-5)
    for a, b_ref_ in zip(log_jacobians_as_list(lj), lj_list_ref):
        assert a.shape == (B, 1)
        assert jnp.allclose(a, b_ref_, atol=1e-5, rtol=1e-5)

    # Multi-tile path: grid of 2 and a ragged (masked) final batch tile.
    B2 = 1000
    z2 = jax.random.normal(kz2, (B2, DIM), jnp.float32)
    zk2, lj2 = normalizing_flow(z2, weights, scales, biases)
    zk2 = jax.block_until_ready(zk2)
    lj2 = jax.block_until_ready(lj2)
    zk2_ref, lj2_list_ref = _reference(z2, weights, scales, biases)
    assert jnp.allclose(zk2, zk2_ref, atol=1e-5, rtol=1e-5)
    lj2_ref = jnp.concatenate(lj2_list_ref, axis=1).T        # (L, B2)
    assert jnp.allclose(lj2, lj2_ref, atol=1e-5, rtol=1e-5)

    print("KERNEL_OK")
</pallas_src>

<mosaic_0001>
module attributes {stable_mosaic.version = 11 : i64} {
  func.func @_normalizing_flow_kernel(%arg0: i32, %arg1: memref<3xf32, #tpu.memory_space<smem>>, %arg2: memref<3xf32, #tpu.memory_space<smem>>, %arg3: memref<4x8xf32, #tpu.memory_space<vmem>>, %arg4: memref<3x4x1xf32, #tpu.memory_space<vmem>>, %arg5: memref<3x4x1xf32, #tpu.memory_space<vmem>>, %arg6: memref<4x8xf32, #tpu.memory_space<vmem>>, %arg7: memref<3x8xf32, #tpu.memory_space<vmem>>) attributes {dimension_semantics = [#tpu.dimension_semantics<parallel>], iteration_bounds = array<i64: 1>, scalar_prefetch = 0 : i64, scratch_operands = 0 : i64, tpu.core_type = #tpu.core_type<tc>, window_params = [{transform_indices = @transform_0, window_bounds = array<i64: 3>}, {transform_indices = @transform_1, window_bounds = array<i64: 3>}, {transform_indices = @transform_2, window_bounds = array<i64: 4, 8>}, {pipeline_mode = #tpu.pipeline_mode<synchronous>, transform_indices = @transform_3, window_bounds = array<i64: 3, 4, 1>}, {pipeline_mode = #tpu.pipeline_mode<synchronous>, transform_indices = @transform_4, window_bounds = array<i64: 3, 4, 1>}, {transform_indices = @transform_5, window_bounds = array<i64: 4, 8>}, {transform_indices = @transform_6, window_bounds = array<i64: 3, 8>}]} {
    %c0 = arith.constant 0 : index
    %c0_0 = arith.constant 0 : index
    %0 = vector.load %arg3[%c0, %c0_0] : memref<4x8xf32, #tpu.memory_space<vmem>>, vector<4x8xf32>
    %c0_1 = arith.constant 0 : index
    %c0_2 = arith.constant 0 : index
    %c0_3 = arith.constant 0 : index
    %1 = vector.load %arg4[%c0_1, %c0_2, %c0_3] : memref<3x4x1xf32, #tpu.memory_space<vmem>>, vector<1x4x1xf32>
    %2 = vector.shape_cast %1 : vector<1x4x1xf32> to vector<4x1xf32>
    %c0_4 = arith.constant 0 : index
    %c0_5 = arith.constant 0 : index
    %c0_6 = arith.constant 0 : index
    %3 = vector.load %arg5[%c0_4, %c0_5, %c0_6] : memref<3x4x1xf32, #tpu.memory_space<vmem>>, vector<1x4x1xf32>
    %4 = vector.shape_cast %3 : vector<1x4x1xf32> to vector<4x1xf32>
    %c0_7 = arith.constant 0 : index
    %5 = memref.load %arg1[%c0_7] : memref<3xf32, #tpu.memory_space<smem>>
    %c0_8 = arith.constant 0 : index
    %6 = memref.load %arg2[%c0_8] : memref<3xf32, #tpu.memory_space<smem>>
    %7 = vector.broadcast %2 : vector<4x1xf32> to vector<4x8xf32>
    %8 = arith.mulf %0, %7 : vector<4x8xf32>
    %cst = arith.constant dense<0.000000e+00> : vector<8xf32>
    %9 = vector.multi_reduction <add>, %8, %cst [0] : vector<4x8xf32> to vector<8xf32>
    %10 = vector.shape_cast %9 : vector<8xf32> to vector<1x8xf32>
    %11 = vector.broadcast %5 : f32 to vector<1x8xf32>
    %12 = arith.addf %10, %11 : vector<1x8xf32>
    %13 = math.tanh %12 : vector<1x8xf32>
    %14 = arith.mulf %13, %13 : vector<1x8xf32>
    %cst_9 = arith.constant 1.000000e+00 : f32
    %15 = vector.broadcast %cst_9 : f32 to vector<1x8xf32>
    %16 = arith.subf %15, %14 : vector<1x8xf32>
    %17 = vector.broadcast %6 : f32 to vector<1x8xf32>
    %18 = arith.mulf %16, %17 : vector<1x8xf32>
    %cst_10 = arith.constant 1.000000e+00 : f32
    %19 = vector.broadcast %cst_10 : f32 to vector<1x8xf32>
    %20 = arith.addf %19, %18 : vector<1x8xf32>
    %21 = math.absf %20 : vector<1x8xf32>
    %cst_11 = arith.constant 1.000000e-07 : f32
    %22 = vector.broadcast %cst_11 : f32 to vector<1x8xf32>
    %23 = arith.addf %21, %22 : vector<1x8xf32>
    %24 = math.log %23 : vector<1x8xf32>
    %25 = vector.broadcast %4 : vector<4x1xf32> to vector<4x8xf32>
    %26 = vector.broadcast %13 : vector<1x8xf32> to vector<4x8xf32>
    %27 = arith.mulf %25, %26 : vector<4x8xf32>
    %28 = arith.addf %0, %27 : vector<4x8xf32>
    %c1 = arith.constant 1 : index
    %c0_12 = arith.constant 0 : index
    %c0_13 = arith.constant 0 : index
    %29 = vector.load %arg4[%c1, %c0_12, %c0_13] : memref<3x4x1xf32, #tpu.memory_space<vmem>>, vector<1x4x1xf32>
    %30 = vector.shape_cast %29 : vector<1x4x1xf32> to vector<4x1xf32>
    %c1_14 = arith.constant 1 : index
    %c0_15 = arith.constant 0 : index
    %c0_16 = arith.constant 0 : index
    %31 = vector.load %arg5[%c1_14, %c0_15, %c0_16] : memref<3x4x1xf32, #tpu.memory_space<vmem>>, vector<1x4x1xf32>
    %32 = vector.shape_cast %31 : vector<1x4x1xf32> to vector<4x1xf32>
    %c1_17 = arith.constant 1 : index
    %33 = memref.load %arg1[%c1_17] : memref<3xf32, #tpu.memory_space<smem>>
    %c1_18 = arith.constant 1 : index
    %34 = memref.load %arg2[%c1_18] : memref<3xf32, #tpu.memory_space<smem>>
    %35 = vector.broadcast %30 : vector<4x1xf32> to vector<4x8xf32>
    %36 = arith.mulf %28, %35 : vector<4x8xf32>
    %cst_19 = arith.constant dense<0.000000e+00> : vector<8xf32>
    %37 = vector.multi_reduction <add>, %36, %cst_19 [0] : vector<4x8xf32> to vector<8xf32>
    %38 = vector.shape_cast %37 : vector<8xf32> to vector<1x8xf32>
    %39 = vector.broadcast %33 : f32 to vector<1x8xf32>
    %40 = arith.addf %38, %39 : vector<1x8xf32>
    %41 = math.tanh %40 : vector<1x8xf32>
    %42 = arith.mulf %41, %41 : vector<1x8xf32>
    %cst_20 = arith.constant 1.000000e+00 : f32
    %43 = vector.broadcast %cst_20 : f32 to vector<1x8xf32>
    %44 = arith.subf %43, %42 : vector<1x8xf32>
    %45 = vector.broadcast %34 : f32 to vector<1x8xf32>
    %46 = arith.mulf %44, %45 : vector<1x8xf32>
    %cst_21 = arith.constant 1.000000e+00 : f32
    %47 = vector.broadcast %cst_21 : f32 to vector<1x8xf32>
    %48 = arith.addf %47, %46 : vector<1x8xf32>
    %49 = math.absf %48 : vector<1x8xf32>
    %cst_22 = arith.constant 1.000000e-07 : f32
    %50 = vector.broadcast %cst_22 : f32 to vector<1x8xf32>
    %51 = arith.addf %49, %50 : vector<1x8xf32>
    %52 = math.log %51 : vector<1x8xf32>
    %53 = vector.broadcast %32 : vector<4x1xf32> to vector<4x8xf32>
    %54 = vector.broadcast %41 : vector<1x8xf32> to vector<4x8xf32>
    %55 = arith.mulf %53, %54 : vector<4x8xf32>
    %56 = arith.addf %28, %55 : vector<4x8xf32>
    %c2 = arith.constant 2 : index
    %c0_23 = arith.constant 0 : index
    %c0_24 = arith.constant 0 : index
    %57 = vector.load %arg4[%c2, %c0_23, %c0_24] : memref<3x4x1xf32, #tpu.memory_space<vmem>>, vector<1x4x1xf32>
    %58 = vector.shape_cast %57 : vector<1x4x1xf32> to vector<4x1xf32>
    %c2_25 = arith.constant 2 : index
    %c0_26 = arith.constant 0 : index
    %c0_27 = arith.constant 0 : index
    %59 = vector.load %arg5[%c2_25, %c0_26, %c0_27] : memref<3x4x1xf32, #tpu.memory_space<vmem>>, vector<1x4x1xf32>
    %60 = vector.shape_cast %59 : vector<1x4x1xf32> to vector<4x1xf32>
    %c2_28 = arith.constant 2 : index
    %61 = memref.load %arg1[%c2_28] : memref<3xf32, #tpu.memory_space<smem>>
    %c2_29 = arith.constant 2 : index
    %62 = memref.load %arg2[%c2_29] : memref<3xf32, #tpu.memory_space<smem>>
    %63 = vector.broadcast %58 : vector<4x1xf32> to vector<4x8xf32>
    %64 = arith.mulf %56, %63 : vector<4x8xf32>
    %cst_30 = arith.constant dense<0.000000e+00> : vector<8xf32>
    %65 = vector.multi_reduction <add>, %64, %cst_30 [0] : vector<4x8xf32> to vector<8xf32>
    %66 = vector.shape_cast %65 : vector<8xf32> to vector<1x8xf32>
    %67 = vector.broadcast %61 : f32 to vector<1x8xf32>
    %68 = arith.addf %66, %67 : vector<1x8xf32>
    %69 = math.tanh %68 : vector<1x8xf32>
    %70 = arith.mulf %69, %69 : vector<1x8xf32>
    %cst_31 = arith.constant 1.000000e+00 : f32
    %71 = vector.broadcast %cst_31 : f32 to vector<1x8xf32>
    %72 = arith.subf %71, %70 : vector<1x8xf32>
    %73 = vector.broadcast %62 : f32 to vector<1x8xf32>
    %74 = arith.mulf %72, %73 : vector<1x8xf32>
    %cst_32 = arith.constant 1.000000e+00 : f32
    %75 = vector.broadcast %cst_32 : f32 to vector<1x8xf32>
    %76 = arith.addf %75, %74 : vector<1x8xf32>
    %77 = math.absf %76 : vector<1x8xf32>
    %cst_33 = arith.constant 1.000000e-07 : f32
    %78 = vector.broadcast %cst_33 : f32 to vector<1x8xf32>
    %79 = arith.addf %77, %78 : vector<1x8xf32>
    %80 = math.log %79 : vector<1x8xf32>
    %81 = vector.broadcast %60 : vector<4x1xf32> to vector<4x8xf32>
    %82 = vector.broadcast %69 : vector<1x8xf32> to vector<4x8xf32>
    %83 = arith.mulf %81, %82 : vector<4x8xf32>
    %84 = arith.addf %56, %83 : vector<4x8xf32>
    %85 = tpu.concatenate %24, %52, %80 in 0 : vector<1x8xf32>, vector<1x8xf32>, vector<1x8xf32> -> vector<3x8xf32>
    %c0_34 = arith.constant 0 : index
    %c0_35 = arith.constant 0 : index
    %86 = vector.load %arg7[%c0_34, %c0_35] : memref<3x8xf32, #tpu.memory_space<vmem>>, vector<3x8xf32>
    tpu.vector_store %arg7[%c0_34, %c0_35], %85 {strides = array<i32>} : memref<3x8xf32, #tpu.memory_space<vmem>>, vector<3x8xf32>,
    %c0_36 = arith.constant 0 : index
    %c0_37 = arith.constant 0 : index
    %87 = vector.load %arg6[%c0_36, %c0_37] : memref<4x8xf32, #tpu.memory_space<vmem>>, vector<4x8xf32>
    tpu.vector_store %arg6[%c0_36, %c0_37], %84 {strides = array<i32>} : memref<4x8xf32, #tpu.memory_space<vmem>>, vector<4x8xf32>,
    return
  }
  func.func @transform_0(%arg0: i32) -> i32 {
    %c0_i32 = arith.constant 0 : i32
    %c0_i32_0 = arith.constant 0 : i32
    return %c0_i32 : i32
  }
  func.func @transform_1(%arg0: i32) -> i32 {
    %c0_i32 = arith.constant 0 : i32
    %c0_i32_0 = arith.constant 0 : i32
    return %c0_i32 : i32
  }
  func.func @transform_2(%arg0: i32) -> (i32, i32) {
    %c0_i32 = arith.constant 0 : i32
    %c0_i32_0 = arith.constant 0 : i32
    return %c0_i32, %arg0 : i32, i32
  }
  func.func @transform_3(%arg0: i32) -> (i32, i32, i32) {
    %c0_i32 = arith.constant 0 : i32
    %c0_i32_0 = arith.constant 0 : i32
    %c0_i32_1 = arith.constant 0 : i32
    %c0_i32_2 = arith.constant 0 : i32
    return %c0_i32, %c0_i32_0, %c0_i32_1 : i32, i32, i32
  }
  func.func @transform_4(%arg0: i32) -> (i32, i32, i32) {
    %c0_i32 = arith.constant 0 : i32
    %c0_i32_0 = arith.constant 0 : i32
    %c0_i32_1 = arith.constant 0 : i32
    %c0_i32_2 = arith.constant 0 : i32
    return %c0_i32, %c0_i32_0, %c0_i32_1 : i32, i32, i32
  }
  func.func @transform_5(%arg0: i32) -> (i32, i32) {
    %c0_i32 = arith.constant 0 : i32
    %c0_i32_0 = arith.constant 0 : i32
    return %c0_i32, %arg0 : i32, i32
  }
  func.func @transform_6(%arg0: i32) -> (i32, i32) {
    %c0_i32 = arith.constant 0 : i32
    %c0_i32_0 = arith.constant 0 : i32
    return %c0_i32, %arg0 : i32, i32
  }
}

</mosaic_0001>

<bundles_post_ra>
// kernel: normalizing_flow.1
= control target key start
LH: loop header
LB: loop body
LE: loop exit
PB: predicated region body
PF: predicated region fallthrough
CT: control target
= control target key end

     0   :  { %12 = vsyncpa [#allocation4], 0  ;;  %s389_s0 = inlined_call_operand.vmem [shape: f32[3], index: 0, kind: input, shape index: {}]   ;;  %s390_s1 = inlined_call_operand.vmem [shape: f32[3], index: 1, kind: input, shape index: {}]   ;;  %s391_s2 = inlined_call_operand.vmem [shape: f32[4,8], index: 2, kind: input, shape index: {}]   ;;  %s392_s3 = inlined_call_operand.vmem [shape: f32[3,4,1], index: 3, kind: input, shape index: {}]   ;;  %s393_s4 = inlined_call_operand.vmem [shape: f32[3,4,1], index: 4, kind: input, shape index: {}]   ;;  %s394_s5 = inlined_call_operand.hbm [shape: f32[4,8], index: 5, kind: output, shape index: {0}]   ;;  %s395_s6 = inlined_call_operand.hbm [shape: f32[3,8], index: 6, kind: output, shape index: {1}]  }
   0x1   :  { %13 = vsyncpa [#allocation6], 0 }
   0x2   :  { %14 = vsyncpa [#allocation3], 0 }
   0x3   :  { %15 = vsyncpa [#allocation9], 0  ;;  %s21_s23 = sshll.u32 %s389_s0, 4  ;;  %s30_s26 = sshll.u32 %s390_s1, 4  ;;  %s22_s23 = int_to_ptr.vmem [resolvable:$true] %s21_s23  ;;  %s31_s26 = int_to_ptr.vmem [resolvable:$true] %s30_s26 }
   0x4   :  { %s312_s27 = smov [#allocation2]   ;;  %s313_s28 = smov [#allocation5]  }
   0x5   :  { %24 = dma.vmem_to_smem %s22_s23, 16, %s312_s27, [#allocation4]  }
   0x6   :  { %33 = dma.vmem_to_smem %s31_s26, 16, %s313_s28, [#allocation6]  }
   0x7   :  { %304 = dma.done.wait [#allocation4], 16  }
   0x8   :  { %305 = vsyncadd [#allocation4], 4294967280 }
   0x9   :  { %306 = dma.done.wait [#allocation6], 16  }
   0xa   :  { %307 = vsyncadd [#allocation6], 4294967280 }
   0xb   :  { %48 = sfence }
   0xc   :  { %v50_v0 = vld [vmem:[%s392_s3] sm:$0xf]  ;;  %v314_v1 = vmov 0   ;;  %v204_v2 = vld [vmem:[%s392_s3 + $0x4] sm:$0xf]  ;;  %vm60_vm0 = vcmask 60416  }
   0xd   :  { %217 = vset.pattern.permute.xlu0 %v314_v1  ;;  %218 = vset.pattern.permute.xlu1 %v314_v1  ;;  %v208_v3 = vld [vmem:[%s392_s3 + $0x8] sm:$0xf]  ;;  %v51_v4 = vld [vmem:[%s393_s4] sm:$0xf]  ;;  %v205_v5 = vld [vmem:[%s393_s4 + $0x4] sm:$0xf] }
   0xe   :  { %56 = vperm.xlu0 %217, %v50_v0   ;;  %95 = vperm.xlu1 %218, %v204_v2   ;;  %v209_v6 = vld [vmem:[%s393_s4 + $0x8] sm:$0xf]  ;;  %v49_v7 = vld [vmem:[%s391_s2] sm:$0xf]  ;;  %s52_s16 = sld [smem:[#allocation2]]  ;;  %s315_s20 = smov [#allocation7]  }
   0xf   :  { %219 = vset.pattern.permute.xlu2 %v314_v1  ;;  %s206_s2 = sld [smem:[#allocation2 + $0x1]]  ;;  %s175_s21 = sshll.u32 %s315_s20, 4  ;;  %vm163_vm1 = vcmask 1040384   ;;  %vm165_vm2 = vcmask 1041408   ;;  %vm167_vm3 = vcmask 59392   ;;  %s176_s21 = int_to_ptr.vmem [resolvable:$true] %s175_s21 }
  0x10   :  { %133 = vperm.xlu2 %219, %v208_v3   ;;  %s207_s4 = sld [smem:[#allocation5 + $0x1]]  ;;  %s177_s24 = sshll.u32 %s394_s5, 4  ;;  %s178_s24 = int_to_ptr.hbm [resolvable:$true] %s177_s24 }
  0x11   :  { %s210_s17 = sld [smem:[#allocation2 + $0x2]]  ;;  %s316_s5 = smov [#allocation8]  }
  0x12   :  { %s53_s18 = sld [smem:[#allocation5]]  ;;  %s186_s25 = sshll.u32 %s316_s5, 4  ;;  %s187_s25 = int_to_ptr.vmem [resolvable:$true] %s186_s25 }
  0x13   :  { %s211_s19 = sld [smem:[#allocation5 + $0x2]]  ;;  %s188_s28 = sshll.u32 %s395_s6, 4  ;;  %s189_s28 = int_to_ptr.hbm [resolvable:$true] %s188_s28 }
  0x14   :  { %v68_v16 = vstv %s52_s16 }
  0x15   :  { %v106_v31 = vstv %s206_s2 }
  0x16   :  { %82 = vperm.xlu0 %217, %v51_v4   ;;  %120 = vperm.xlu1 %218, %v205_v5   ;;  %v111_v50 = vstv %s207_s4 }
  0x17   :  { %v144_v49 = vstv %s210_s17 }
  0x18   :  { %158 = vperm.xlu2 %219, %v209_v6   ;;  %v73_v53 = vstv %s53_s18 }
  0x19   :  { %v149_v1 = vstv %s211_s19 }
  0x6a   :  { %v134_v38 = vpop.permute.xlu2 %133 }
  0x72   :  { %v159_v60 = vpop.permute.xlu2 %158 }
  0x80   :  { %v57_v8 = vpop.permute.xlu0 %56  ;;  %v96_v23 = vpop.permute.xlu1 %95 }
  0x81   :  { %v59_v9 = vmul.f32 %v57_v8, %v49_v7 }
  0x83   :  { %v61_v10 = vsel %vm60_vm0, %v59_v9, 0.0 }
  0x84   :  { %v62_v11 = vrot.slane %v61_v10, 4 }
  0x86   :  { %v63_v12 = vadd.f32 %v62_v11, %v61_v10 }
  0x88   :  { %v64_v13 = vrot.slane %v63_v12, 2  ;;  %v83_v20 = vpop.permute.xlu0 %82  ;;  %v121_v35 = vpop.permute.xlu1 %120 }
  0x8a   :  { %v65_v14 = vadd.f32 %v64_v13, %v63_v12 }
  0x8c   :  { %v66_v15 = vrot.slane %v65_v14, 1 }
  0x8e   :  { %v67_v17 = vadd.f32 %v66_v15, %v65_v14 }
  0x90   :  { %v69_v18 = vadd.f32 %v68_v16, %v67_v17 }
  0x92   :  { %220 = vtanh.f32 %v69_v18 }
  0x98   :  { %v221_v19 = vpop.eup %220 }
  0x99   :  { %v85_v21 = vmul.f32 %v221_v19, %v83_v20  ;;  %v71_v45 = vmul.f32 %v221_v19, %v221_v19 }
  0x9b   :  { %v86_v22 = vadd.f32 %v85_v21, %v49_v7  ;;  %v72_v51 = vsub.f32 1.0, %v71_v45 }
  0x9d   :  { %v98_v24 = vmul.f32 %v96_v23, %v86_v22  ;;  %v74_v56 = vmul.f32 %v73_v53, %v72_v51 }
  0x9f   :  { %v99_v25 = vsel %vm60_vm0, %v98_v24, 0.0  ;;  %v75_v58 = vadd.f32 1.0, %v74_v56 }
  0xa0   :  { %v100_v26 = vrot.slane %v99_v25, 4 }
  0xa1   :  { %v76_v0 = vand.u32 2147483647, %v75_v58 }
  0xa2   :  { %v101_v27 = vadd.f32 %v100_v26, %v99_v25 }
  0xa3   :  { %v77_v6 = vadd.f32 1e-07, %v76_v0 }
  0xa4   :  { %v102_v28 = vrot.slane %v101_v27, 2 }
  0xa6   :  { %v103_v29 = vadd.f32 %v102_v28, %v101_v27 }
  0xa8   :  { %v104_v30 = vrot.slane %v103_v29, 1 }
  0xaa   :  { %v105_v32 = vadd.f32 %v104_v30, %v103_v29 }
  0xac   :  { %v107_v33 = vadd.f32 %v106_v31, %v105_v32 }
  0xae   :  { %222 = vtanh.f32 %v107_v33 }
  0xb4   :  { %v223_v34 = vpop.eup %222 }
  0xb5   :  { %v123_v36 = vmul.f32 %v223_v34, %v121_v35  ;;  %v109_v43 = vmul.f32 %v223_v34, %v223_v34 }
  0xb7   :  { %v124_v37 = vadd.f32 %v123_v36, %v86_v22  ;;  %v110_v47 = vsub.f32 1.0, %v109_v43 }
  0xb9   :  { %v136_v39 = vmul.f32 %v134_v38, %v124_v37  ;;  %v112_v55 = vmul.f32 %v111_v50, %v110_v47 }
  0xbb   :  { %v137_v40 = vsel %vm60_vm0, %v136_v39, 0.0  ;;  %v113_v57 = vadd.f32 1.0, %v112_v55 }
  0xbc   :  { %v138_v41 = vrot.slane %v137_v40, 4 }
  0xbd   :  { %v114_v61 = vand.u32 2147483647, %v113_v57 }
  0xbe   :  { %v139_v42 = vadd.f32 %v138_v41, %v137_v40 }
  0xbf   :  { %v115_v4 = vadd.f32 1e-07, %v114_v61 }
  0xc0   :  { %v140_v44 = vrot.slane %v139_v42, 2 }
  0xc2   :  { %v141_v46 = vadd.f32 %v140_v44, %v139_v42 }
  0xc4   :  { %v142_v48 = vrot.slane %v141_v46, 1 }
  0xc6   :  { %v143_v52 = vadd.f32 %v142_v48, %v141_v46 }
  0xc8   :  { %v145_v54 = vadd.f32 %v144_v49, %v143_v52 }
  0xca   :  { %224 = vtanh.f32 %v145_v54 }
  0xcb   :  { %226 = vlog2.f32 %v115_v4 }
  0xcc   :  { %228 = vlog2.f32 %v77_v6 }
  0xd0   :  { %v225_v59 = vpop.eup %224 }
  0xd1   :  { %v161_v62 = vmul.f32 %v225_v59, %v159_v60  ;;  %v147_v63 = vmul.f32 %v225_v59, %v225_v59  ;;  %v227_v10 = vpop.eup %226 }
  0xd2   :  { %v229_v11 = vpop.eup %228  ;;  %v117_v12 = vmul.f32 0.6931472, %v227_v10 }
  0xd3   :  { %v162_v2 = vadd.f32 %v161_v62, %v124_v37  ;;  %v148_v3 = vsub.f32 1.0, %v147_v63  ;;  %v79_v14 = vmul.f32 0.6931472, %v229_v11 }
  0xd5   :  { %169 = vst.msk [vmem:[#allocation7] sm:$0xf] %vm60_vm0, %v162_v2  ;;  %v150_v5 = vmul.f32 %v149_v1, %v148_v3  ;;  %v164_v16 = vsel %vm163_vm1, %v79_v14, %v117_v12 }
  0xd6   :  { %180 = dma.vmem_to_hbm [thread:$0]  %s176_s21, 64, %s178_s24, [#allocation3]  }
  0xd7   :  { %v151_v7 = vadd.f32 1.0, %v150_v5 }
  0xd9   :  { %v152_v8 = vand.u32 2147483647, %v151_v7 }
  0xdb   :  { %v153_v9 = vadd.f32 1e-07, %v152_v8 }
  0xdd   :  { %230 = vlog2.f32 %v153_v9 }
  0xe3   :  { %v231_v13 = vpop.eup %230 }
  0xe4   :  { %v155_v15 = vmul.f32 0.6931472, %v231_v13 }
  0xe6   :  { %v166_v17 = vsel %vm165_vm2, %v164_v16, %v155_v15 }
  0xe7   :  { %168 = vst.msk [vmem:[#allocation8] sm:$0x7] %vm167_vm3, %v166_v17 }
  0xe8   :  { %191 = dma.vmem_to_hbm [thread:$0]  %s187_s25, 64, %s189_s28, [#allocation9]  }
  0xe9   :  { %308 = dma.done.wait [#allocation3], 64  }
  0xea   :  { %309 = vsyncadd [#allocation3], 4294967232 }
  0xeb   :  { %310 = dma.done.wait [#allocation9], 64  }
  0xec   :  { %311 = vsyncadd [#allocation9], 4294967232 }
  0xed   :  { %200 = vsyncpa [#allocation3], 1 }
  0xee   :  { %201 = vsyncpa [#allocation9], 1 }
  0xef   :  { %202 = vsyncpa [#allocation4], 1 }
  0xf0   :  { %203 = vsyncpa [#allocation6], 1 }

</bundles_post_ra>
